<compile_context>
chip_gen: v7x
topology: tpu7x:2x2x1
jax: 0.10.0
libtpu: 0.0.40
codegen_flags: <defaults>
</compile_context>

<pallas_src>
import functools
from typing import NamedTuple, Optional

import numpy as np
import jax
import jax.numpy as jnp
from jax import lax
from jax.experimental import pallas as pl
from jax.experimental.pallas import tpu as pltpu


def _round_up(x, m):
    return ((x + m - 1) // m) * m


def _cdiv(a, b):
    return (a + b - 1) // b


def _vmem_capacity_bytes():
    try:
        return int(pltpu.get_tpu_info().vmem_capacity_bytes)
    except Exception:
        return 64 << 20        # conservative default (v7x per-TensorCore VMEM)


# --------------------------------------------------------------------------
# One-time parameter preparation (hoisted out of the per-call path).
# --------------------------------------------------------------------------
class EncoderParams(NamedTuple):
    weight: jax.Array        # (img_dim_p, embed_p) compute dtype, zero-padded
    bias: jax.Array          # (1, embed_p) float32, zero-padded
    img_dim: int             # logical input feature dim
    embed_size: int          # logical output dim
    k_tile: Optional[int]    # reduction tile; None => weight resident in VMEM


def prepare_params(weight_t, bias, *, compute_dtype=jnp.bfloat16,
                   embed_multiple=128, k_tile="auto"):
    """Cast + pad the (pre-transposed, [img_dim, embed]) nn.Linear weight and
    bias.  Call once; reuse the returned EncoderParams for every forward."""
    img_dim, embed = weight_t.shape
    embed_p = _round_up(embed, embed_multiple)
    w_item = jnp.dtype(compute_dtype).itemsize

    if k_tile == "auto":
        # Keep the resident weight under ~30% of VMEM, otherwise K-tile.
        budget = int(0.30 * _vmem_capacity_bytes())
        if img_dim * embed_p * w_item <= budget:
            k_tile = None
        else:
            img_dim_128 = _round_up(img_dim, 128)
            max_tk = max(128, (budget // (embed_p * w_item)) // 128 * 128)
            k_tile = 128
            for cand in range(max_tk, 127, -128):
                if img_dim_128 % cand == 0:
                    k_tile = cand
                    break

    if k_tile is not None:
        k_tile = _round_up(int(k_tile), 128)
        img_dim_p = _round_up(img_dim, k_tile)
    else:
        img_dim_p = img_dim

    w = weight_t.astype(compute_dtype)
    b2 = bias.reshape(1, embed).astype(jnp.float32)
    if img_dim_p != img_dim or embed_p != embed:
        w = jnp.pad(w, ((0, img_dim_p - img_dim), (0, embed_p - embed)))
    if embed_p != embed:
        b2 = jnp.pad(b2, ((0, 0), (0, embed_p - embed)))
    return EncoderParams(w, b2, img_dim, embed, k_tile)


# --------------------------------------------------------------------------
# Kernels
# --------------------------------------------------------------------------
def _finish(feats, o_ref, no_imgnorm, use_abs):
    if not no_imgnorm:
        sq = jnp.sum(feats * feats, axis=1, keepdims=True)
        # tiny-guard: padded / all-zero rows produce 0 instead of NaN; padded
        # embed lanes are exactly 0 (zero weight cols + zero bias) so they do
        # not perturb the reduction.
        inv = lax.rsqrt(jnp.maximum(sq, jnp.finfo(jnp.float32).tiny))
        feats = feats * inv
    if use_abs:
        feats = jnp.abs(feats)
    o_ref[...] = feats.astype(o_ref.dtype)


def _fwd_kernel(x_ref, w_ref, b_ref, o_ref, *, no_imgnorm, use_abs):
    # x is f32 from HBM; cast on-chip to the weight dtype (bf16 MXU path).
    feats = jnp.dot(x_ref[...].astype(w_ref.dtype), w_ref[...],
                    preferred_element_type=jnp.float32) + b_ref[...]
    _finish(feats, o_ref, no_imgnorm, use_abs)


def _fwd_kernel_ktiled(x_ref, w_ref, b_ref, o_ref, acc_ref, *,
                       no_imgnorm, use_abs):
    k = pl.program_id(1)

    @pl.when(k == 0)
    def _():
        acc_ref[...] = jnp.zeros_like(acc_ref)

    acc_ref[...] += jnp.dot(x_ref[...].astype(w_ref.dtype), w_ref[...],
                            preferred_element_type=jnp.float32)

    @pl.when(k == pl.num_programs(1) - 1)
    def _():
        _finish(acc_ref[...] + b_ref[...], o_ref, no_imgnorm, use_abs)


# --------------------------------------------------------------------------
# Forward wrapper
# --------------------------------------------------------------------------
def encoder_image_precomp(images, params: EncoderParams, *,
                          out_dtype=jnp.float32, tm_target=256,
                          no_imgnorm=False, use_abs=False):
    """images: [B, img_dim] float.  Returns [B, embed_size].
    out_dtype=jnp.bfloat16 halves output HBM traffic if the consumer allows."""
    B, img_dim = images.shape
    assert img_dim == params.img_dim, "images feature dim mismatch"
    img_dim_p, embed_p = params.weight.shape
    embed = params.embed_size
    tk = params.k_tile

    # ---- batch tiling: bounded waste, >=2 tiles when possible (v7x 2 TCs) --
    if B <= 8:
        tm = 8
    else:
        n_tiles = max(_cdiv(B, tm_target), 2)
        n_tiles = min(n_tiles, _cdiv(B, 8))
        tm = _round_up(_cdiv(B, n_tiles), 8)
    n_tiles = _cdiv(B, tm)
    B_p = n_tiles * tm

    # ---- input padding only when actually needed ---------------------------
    x = images
    pad_rows = B_p - B
    pad_cols = (img_dim_p - img_dim) if tk is not None else 0
    if pad_rows or pad_cols:
        x = jnp.pad(x, ((0, pad_rows), (0, pad_cols)))

    x_item = jnp.dtype(x.dtype).itemsize
    w_item = jnp.dtype(params.weight.dtype).itemsize
    out_item = jnp.dtype(out_dtype).itemsize
    kk = tk if tk is not None else img_dim_p

    cost = pl.CostEstimate(
        flops=2 * B_p * img_dim_p * embed_p,
        transcendentals=B_p,
        bytes_accessed=(B_p * img_dim_p * x_item
                        + img_dim_p * embed_p * w_item
                        + embed_p * 4
                        + B_p * embed_p * out_item))

    def launch(single_buffer_invariants):
        def inv_spec(shape, index_map):
            # Grid-invariant operands: single-buffer to halve resident VMEM.
            if single_buffer_invariants:
                try:
                    return pl.BlockSpec(shape, index_map,
                                        pipeline_mode=pl.Buffered(1))
                except TypeError:
                    pass
            return pl.BlockSpec(shape, index_map)

        acc_bytes = 0
        if tk is None:
            kernel = functools.partial(_fwd_kernel, no_imgnorm=no_imgnorm,
                                       use_abs=use_abs)
            grid = (n_tiles,)
            in_specs = [
                pl.BlockSpec((tm, img_dim_p), lambda i: (i, 0)),
                inv_spec((img_dim_p, embed_p), lambda i: (0, 0)),
                inv_spec((1, embed_p), lambda i: (0, 0)),
            ]
            out_specs = pl.BlockSpec((tm, embed_p), lambda i: (i, 0))
            scratch = ()
            dims = ("parallel",)
            w_bufs = 1 if single_buffer_invariants else 2
        else:
            kernel = functools.partial(_fwd_kernel_ktiled,
                                       no_imgnorm=no_imgnorm, use_abs=use_abs)
            grid = (n_tiles, img_dim_p // tk)
            in_specs = [
                pl.BlockSpec((tm, tk), lambda i, k: (i, k)),
                pl.BlockSpec((tk, embed_p), lambda i, k: (k, 0)),
                inv_spec((1, embed_p), lambda i, k: (0, 0)),
            ]
            out_specs = pl.BlockSpec((tm, embed_p), lambda i, k: (i, 0))
            scratch = (pltpu.VMEM((tm, embed_p), jnp.float32),)
            dims = ("parallel", "arbitrary")
            acc_bytes = tm * embed_p * 4
            w_bufs = 2

        vmem_est = (2 * tm * kk * x_item                 # x tile (dbl-buffered)
                    + w_bufs * kk * embed_p * w_item     # weight tile
                    + embed_p * 4                        # bias
                    + 2 * tm * embed_p * out_item        # output tile
                    + acc_bytes)                         # f32 accumulator
        vmem_limit = int(min(max(int(vmem_est * 1.25) + (1 << 20), 16 << 20),
                             int(0.85 * _vmem_capacity_bytes())))

        return pl.pallas_call(
            kernel,
            out_shape=jax.ShapeDtypeStruct((B_p, embed_p), out_dtype),
            grid_spec=pltpu.PrefetchScalarGridSpec(
                num_scalar_prefetch=0,
                grid=grid,
                in_specs=in_specs,
                out_specs=out_specs,
                scratch_shapes=scratch),
            compiler_params=pltpu.CompilerParams(
                dimension_semantics=dims,
                vmem_limit_bytes=vmem_limit),
            cost_estimate=cost,
        )(x, params.weight, params.bias)

    try:
        out = launch(single_buffer_invariants=True)
    except Exception:
        # pl.Buffered(1) not supported by this jax build -> default buffering.
        out = launch(single_buffer_invariants=False)

    if B_p != B or embed_p != embed:
        out = out[:B, :embed]
    return out


# --------------------------------------------------------------------------
# Init / reference (mirror the PyTorch module)
# --------------------------------------------------------------------------
def init_params(key, img_dim, embed_size):
    """Xavier-uniform init exactly as the PyTorch module's init_weights()."""
    r = np.sqrt(6.0) / np.sqrt(img_dim + embed_size)
    # torch stores weight as [embed, img_dim]; keep it transposed [img_dim, embed]
    weight_t = jax.random.uniform(key, (img_dim, embed_size),
                                  minval=-r, maxval=r, dtype=jnp.float32)
    bias = jnp.zeros((embed_size,), dtype=jnp.float32)
    return weight_t, bias


def reference(images, weight_t, bias, *, no_imgnorm=False, use_abs=False):
    feats = images @ weight_t + bias
    if not no_imgnorm:
        feats = feats / jnp.sqrt(jnp.sum(feats ** 2, axis=1, keepdims=True))
    if use_abs:
        feats = jnp.abs(feats)
    return feats

# TODO(synk): load_state_dict / parameter-copy plumbing is host-side bookkeeping
# with no kernel equivalent; weights are supplied via prepare_params() instead.


if __name__ == "__main__":
    key = jax.random.PRNGKey(0)
    k1, k2, k3, k4 = jax.random.split(key, 4)

    # ---- case 1: unaligned batch/embed, f32 compute (tight tolerance) ------
    B, D, E = 10, 48, 96
    images = jax.random.normal(k1, (B, D), dtype=jnp.float32)
    weight_t, bias = init_params(k2, D, E)
    ref = reference(images, weight_t, bias)

    params_f32 = prepare_params(weight_t, bias, compute_dtype=jnp.float32)
    out = encoder_image_precomp(images, params_f32)
    jax.block_until_ready(out)
    np.testing.assert_allclose(np.asarray(out), np.asarray(ref),
                               rtol=1e-5, atol=1e-5)

    # ---- case 2: same inputs, bf16 compute (default production path) -------
    params_bf16 = prepare_params(weight_t, bias)   # one-time bf16/pad prep
    out = encoder_image_precomp(images, params_bf16)
    jax.block_until_ready(out)
    np.testing.assert_allclose(np.asarray(out), np.asarray(ref),
                               rtol=2e-2, atol=2e-2)

    # ---- case 3: forced K-tiled reduction path (f32 accumulator) -----------
    B, D, E = 12, 384, 256
    images = jax.random.normal(k3, (B, D), dtype=jnp.float32)
    weight_t, bias = init_params(k4, D, E)
    ref = reference(images, weight_t, bias)
    params_kt = prepare_params(weight_t, bias, compute_dtype=jnp.float32,
                               k_tile=128)
    out = encoder_image_precomp(images, params_kt)
    jax.block_until_ready(out)
    np.testing.assert_allclose(np.asarray(out), np.asarray(ref),
                               rtol=1e-4, atol=1e-4)

    print("KERNEL_OK")
</pallas_src>

<mosaic_0001>
module attributes {stable_mosaic.version = 11 : i64} {
  func.func @_fwd_kernel(%arg0: i32, %arg1: memref<8x48xf32, #tpu.memory_space<vmem>>, %arg2: memref<48x128xf32, #tpu.memory_space<vmem>>, %arg3: memref<1x128xf32, #tpu.memory_space<vmem>>, %arg4: memref<8x128xf32, #tpu.memory_space<vmem>>) attributes {dimension_semantics = [#tpu.dimension_semantics<parallel>], iteration_bounds = array<i64: 2>, scalar_prefetch = 0 : i64, scratch_operands = 0 : i64, tpu.core_type = #tpu.core_type<tc>, window_params = [{transform_indices = @transform_0, window_bounds = array<i64: 8, 48>}, {pipeline_mode = #tpu.pipeline_mode<synchronous>, transform_indices = @transform_1, window_bounds = array<i64: 48, 128>}, {pipeline_mode = #tpu.pipeline_mode<synchronous>, transform_indices = @transform_2, window_bounds = array<i64: 1, 128>}, {transform_indices = @transform_3, window_bounds = array<i64: 8, 128>}]} {
    %c0 = arith.constant 0 : index
    %c0_0 = arith.constant 0 : index
    %0 = vector.load %arg1[%c0, %c0_0] : memref<8x48xf32, #tpu.memory_space<vmem>>, vector<8x48xf32>
    %c0_1 = arith.constant 0 : index
    %c0_2 = arith.constant 0 : index
    %1 = vector.load %arg2[%c0_1, %c0_2] : memref<48x128xf32, #tpu.memory_space<vmem>>, vector<48x128xf32>
    %cst = arith.constant dense<0.000000e+00> : vector<8x128xf32>
    %2 = tpu.matmul %0, %1, %cst {dimension_numbers = #tpu.dot_dimension_numbers<[1], [0], [0], [1], [0, 0, 1, 1], [], []>} : vector<8x48xf32>, vector<48x128xf32>, vector<8x128xf32> -> vector<8x128xf32>
    %c0_3 = arith.constant 0 : index
    %c0_4 = arith.constant 0 : index
    %3 = vector.load %arg3[%c0_3, %c0_4] : memref<1x128xf32, #tpu.memory_space<vmem>>, vector<1x128xf32>
    %4 = vector.broadcast %3 : vector<1x128xf32> to vector<8x128xf32>
    %5 = arith.addf %2, %4 : vector<8x128xf32>
    %6 = arith.mulf %5, %5 : vector<8x128xf32>
    %cst_5 = arith.constant dense<0.000000e+00> : vector<8xf32>
    %7 = vector.multi_reduction <add>, %6, %cst_5 [1] : vector<8x128xf32> to vector<8xf32>
    %8 = vector.shape_cast %7 : vector<8xf32> to vector<8x1xf32>
    %cst_6 = arith.constant 1.17549435E-38 : f32
    %9 = vector.broadcast %cst_6 : f32 to vector<8x1xf32>
    %10 = arith.maximumf %8, %9 : vector<8x1xf32>
    %11 = math.rsqrt %10 : vector<8x1xf32>
    %12 = vector.broadcast %11 : vector<8x1xf32> to vector<8x128xf32>
    %13 = arith.mulf %5, %12 : vector<8x128xf32>
    %c0_7 = arith.constant 0 : index
    %c0_8 = arith.constant 0 : index
    %14 = vector.load %arg4[%c0_7, %c0_8] : memref<8x128xf32, #tpu.memory_space<vmem>>, vector<8x128xf32>
    tpu.vector_store %arg4[%c0_7, %c0_8], %13 {strides = array<i32>} : memref<8x128xf32, #tpu.memory_space<vmem>>, vector<8x128xf32>,
    return
  }
  func.func @transform_0(%arg0: i32) -> (i32, i32) {
    %c0_i32 = arith.constant 0 : i32
    %c0_i32_0 = arith.constant 0 : i32
    return %arg0, %c0_i32 : i32, i32
  }
  func.func @transform_1(%arg0: i32) -> (i32, i32) {
    %c0_i32 = arith.constant 0 : i32
    %c0_i32_0 = arith.constant 0 : i32
    %c0_i32_1 = arith.constant 0 : i32
    return %c0_i32, %c0_i32_0 : i32, i32
  }
  func.func @transform_2(%arg0: i32) -> (i32, i32) {
    %c0_i32 = arith.constant 0 : i32
    %c0_i32_0 = arith.constant 0 : i32
    %c0_i32_1 = arith.constant 0 : i32
    return %c0_i32, %c0_i32_0 : i32, i32
  }
  func.func @transform_3(%arg0: i32) -> (i32, i32) {
    %c0_i32 = arith.constant 0 : i32
    %c0_i32_0 = arith.constant 0 : i32
    return %arg0, %c0_i32 : i32, i32
  }
}

module attributes {stable_mosaic.version = 11 : i64} {
  func.func @_fwd_kernel(%arg0: i32, %arg1: memref<8x48xf32, #tpu.memory_space<vmem>>, %arg2: memref<48x128xf32, #tpu.memory_space<vmem>>, %arg3: memref<1x128xf32, #tpu.memory_space<vmem>>, %arg4: memref<8x128xf32, #tpu.memory_space<vmem>>) attributes {dimension_semantics = [#tpu.dimension_semantics<parallel>], iteration_bounds = array<i64: 2>, scalar_prefetch = 0 : i64, scratch_operands = 0 : i64, tpu.core_type = #tpu.core_type<tc>, window_params = [{transform_indices = @transform_0, window_bounds = array<i64: 8, 48>}, {pipeline_mode = #tpu.pipeline_mode<synchronous>, transform_indices = @transform_1, window_bounds = array<i64: 48, 128>}, {pipeline_mode = #tpu.pipeline_mode<synchronous>, transform_indices = @transform_2, window_bounds = array<i64: 1, 128>}, {transform_indices = @transform_3, window_bounds = array<i64: 8, 128>}]} {
    %c0 = arith.constant 0 : index
    %c0_0 = arith.constant 0 : index
    %0 = vector.load %arg1[%c0, %c0_0] : memref<8x48xf32, #tpu.memory_space<vmem>>, vector<8x48xf32>
    %c0_1 = arith.constant 0 : index
    %c0_2 = arith.constant 0 : index
    %1 = vector.load %arg2[%c0_1, %c0_2] : memref<48x128xf32, #tpu.memory_space<vmem>>, vector<48x128xf32>
    %cst = arith.constant dense<0.000000e+00> : vector<8x128xf32>
    %2 = tpu.matmul %0, %1, %cst {dimension_numbers = #tpu.dot_dimension_numbers<[1], [0], [0], [1], [0, 0, 1, 1], [], []>} : vector<8x48xf32>, vector<48x128xf32>, vector<8x128xf32> -> vector<8x128xf32>
    %c0_3 = arith.constant 0 : index
    %c0_4 = arith.constant 0 : index
    %3 = vector.load %arg3[%c0_3, %c0_4] : memref<1x128xf32, #tpu.memory_space<vmem>>, vector<1x128xf32>
    %4 = vector.broadcast %3 : vector<1x128xf32> to vector<8x128xf32>
    %5 = arith.addf %2, %4 : vector<8x128xf32>
    %6 = arith.mulf %5, %5 : vector<8x128xf32>
    %cst_5 = arith.constant dense<0.000000e+00> : vector<8xf32>
    %7 = vector.multi_reduction <add>, %6, %cst_5 [1] : vector<8x128xf32> to vector<8xf32>
    %8 = vector.shape_cast %7 : vector<8xf32> to vector<8x1xf32>
    %cst_6 = arith.constant 1.17549435E-38 : f32
    %9 = vector.broadcast %cst_6 : f32 to vector<8x1xf32>
    %10 = arith.maximumf %8, %9 : vector<8x1xf32>
    %11 = math.rsqrt %10 : vector<8x1xf32>
    %12 = vector.broadcast %11 : vector<8x1xf32> to vector<8x128xf32>
    %13 = arith.mulf %5, %12 : vector<8x128xf32>
    %c0_7 = arith.constant 0 : index
    %c0_8 = arith.constant 0 : index
    %14 = vector.load %arg4[%c0_7, %c0_8] : memref<8x128xf32, #tpu.memory_space<vmem>>, vector<8x128xf32>
    tpu.vector_store %arg4[%c0_7, %c0_8], %13 {strides = array<i32>} : memref<8x128xf32, #tpu.memory_space<vmem>>, vector<8x128xf32>,
    return
  }
  func.func @transform_0(%arg0: i32) -> (i32, i32) {
    %c0_i32 = arith.constant 0 : i32
    %c0_i32_0 = arith.constant 0 : i32
    return %arg0, %c0_i32 : i32, i32
  }
  func.func @transform_1(%arg0: i32) -> (i32, i32) {
    %c0_i32 = arith.constant 0 : i32
    %c0_i32_0 = arith.constant 0 : i32
    %c0_i32_1 = arith.constant 0 : i32
    return %c0_i32, %c0_i32_0 : i32, i32
  }
  func.func @transform_2(%arg0: i32) -> (i32, i32) {
    %c0_i32 = arith.constant 0 : i32
    %c0_i32_0 = arith.constant 0 : i32
    %c0_i32_1 = arith.constant 0 : i32
    return %c0_i32, %c0_i32_0 : i32, i32
  }
  func.func @transform_3(%arg0: i32) -> (i32, i32) {
    %c0_i32 = arith.constant 0 : i32
    %c0_i32_0 = arith.constant 0 : i32
    return %arg0, %c0_i32 : i32, i32
  }
}

</mosaic_0001>

<bundles_post_ra>
// kernel: tpu_custom_call.1
= control target key start
LH: loop header
LB: loop body
LE: loop exit
PB: predicated region body
PF: predicated region fallthrough
CT: control target
= control target key end

     0   :  { %8 = vsyncpa [#allocation3], 0  ;;  %s862_s0 = inlined_call_operand.hbm [shape: f32[16,48], index: 0, kind: input, shape index: {}]   ;;  %s863_s1 = inlined_call_operand.hbm [shape: f32[48,128], index: 1, kind: input, shape index: {}]   ;;  %s864_s2 = inlined_call_operand.vmem [shape: f32[1,128], index: 2, kind: input, shape index: {}]   ;;  %s865_s3 = inlined_call_operand.hbm [shape: f32[16,128], index: 3, kind: output, shape index: {}]  }
   0x1   :  { %10 = vsyncpa [#allocation3 + $0x1], 0 }
   0x2   :  { %11 = vsyncpa [#allocation6], 0 }
   0x3   :  { %12 = vsyncpa [#allocation4], 0 }
   0x4   :  { %14 = vsyncpa [#allocation4 + $0x1], 0  ;;  %s659_s12 = smov 0   ;;  %s661_s13 = smov 0  }
   0x5   :  { %s663_s14 = smov 0   ;;  %s665_s15 = smov 0  }
   0x6 LB: > { %s680_s16 = sadd.s32 4294967295, %s629_s15   ;;  %s390_s17 = sadd.s32 4294967294, %s629_s15   ;;  %s629_s15 = sphi %s665_s15, %s885_s15   ;;  %s625_s14 = sphi %s663_s14, %s884_s14   ;;  %s621_s13 = sphi %s661_s13, %s883_s13   ;;  %s617_s12 = sphi %s659_s12, %s882_s12  }
   0x7   : > { %p40_p0 = scmp.ne.s32.totalorder %s621_s13, %s617_s12  ;;  %p866_p1 = scmp.eq.s32.totalorder %s680_s16, 0 }
   0x8   : > { %p112_p3 = scmp.eq.s32.totalorder %s390_s17, 1  ;;  %p391_p5 = scmp.ge.s32.totalorder %s629_s15, 1 }
   0x9   : > { %p689_p4 = por %p866_p1, %p40_p0  ;;  %p119_p7 = scmp.lt.s32.totalorder %s629_s15, 3 }
   0xa   : > { %p694_p6 = por %p112_p3, %p40_p0  ;;  %s631_s21 = smov [#allocation5]  }
   0xb   : > { %s869_s18 = scalar_select %p689_p4, 1, 0 }
   0xc   : > { %s870_s19 = scalar_select %p694_p6, 1, 0 }
   0xd   : > { %p699_p8 = pnand %p391_p5, %p119_p7  ;;  %s131_s22 = sshll.u32 %s631_s21, 4  ;;  %s703_s22 = int_to_ptr.vmem [resolvable:$true] %s131_s22 }
   0xe   : > { %s715_s24 = sadd.s32 1, %s629_s15   ;;  %s27_s25 = sadd.s32 1, %s625_s14 }
   0xf   : > { %s871_s20 = scalar_select %p699_p8, 1, 0 }
  0x10   : > { %p445_p9 = pneg %p699_p8  ;;  %s24_s26 = ssub.s32 %s629_s15, %s715_s24 }
  0x11   : > { %s501_s29 = scalar_lea.hbm %s863_s1, 768 }
  0x12   : > { %p710_p11 = pnand %p445_p9, %p866_p1  ;;  %p502_p12 = scmp.ne.s32.totalorder %s863_s1, %s501_s29 }
  0x13   : > { %p508_p5 = scmp.lt.u32.totalorder %s501_s29, %s863_s1 }
  0x14   : > { %p503_p13 = pneg %p710_p11 }
  0x16   : > { %p504_p0 = pnand %p503_p13, %p502_p12 }
  0x18   : > { %p505_p3 = pneg %p504_p0 }
  0x1a   : > { %p510_p7 = pnand %p508_p5, %p505_p3 }
  0x1c   : > { %513 = shalt.err (!%p510_p7)
}
  0x1d   : > { %s514_s7 = scalar_lea.vmem %s703_s22, 768  ;;  %p522_p2 = scmp.lt.s32.totalorder %s703_s22, %s703_s22 }
  0x1e   : > { %p515_p9 = scmp.ne.s32.totalorder %s703_s22, %s514_s7  ;;  %p523_p6 = scmp.lt.s32.totalorder %s514_s7, %s514_s7 }
  0x20   : > { %p517_p10 = pnand %p515_p9, %p503_p13  ;;  %p524_p4 = por %p523_p6, %p522_p2 }
  0x22   : > { %p518_p1 = pneg %p517_p10 }
  0x24   : > { %p525_p8 = pnand %p524_p4, %p518_p1 }
  0x26   : > { %528 = shalt.err (!%p525_p8)
}
  0x27   : > { %s632_s8 = smov 128   ;;  %s633_s9 = smov 8  }
  0x28   : > { %448 = dma.hbm_to_vmem [thread:$0]  (!%p710_p11), %s863_s1, 768, %s703_s22, [#allocation6], %s632_s8, %s632_s8, %s633_s9  }
  0x29   : > { %p25_p2 = scmp.eq.s32.totalorder %s24_s26, 0  ;;  %p34_p1 = scmp.ne.s32.totalorder %s625_s14, %s621_s13 }
  0x2a   : > { %p35_p4 = scmp.eq.s32.totalorder %s629_s15, 0  ;;  %p458_p6 = scmp.lt.s32.totalorder %s629_s15, 2 }
  0x2b   : > { %s746_s17 = scalar_select %p25_p2, %s625_s14, %s27_s25  }
  0x2c   : > { %p36_p8 = por %p35_p4, %p34_p1  ;;  %p873_p10 = scmp.eq.s32.totalorder %s680_s16, 1 }
  0x2d   : > { %s148_s27 = sand.u32 1, %s625_s14   ;;  %s395_s28 = sshll.u32 %s629_s15, 7 }
  0x2e   : > { %p750_p12 = por %p873_p10, %p34_p1  ;;  %s394_s29 = sshll.u32 %s148_s27, 3 }
  0x2f   : > { %s759_s4 = scalar_lea.hbm %s862_s0, %s395_s28  ;;  %s152_s22 = scalar_lea.vmem [#allocation2], %s394_s29 }
  0x30   : > { %s159_s25 = sshll.u32 %s152_s22, 4  ;;  %p761_p11 = pnand %p458_p6, %p36_p8  ;;  %s765_s25 = int_to_ptr.vmem [resolvable:$true] %s159_s25 }
  0x31   : > { %s149_s5 = scalar_lea.sflag [#allocation3], %s148_s27  ;;  %s529_s6 = scalar_lea.hbm %s759_s4, 128 }
  0x32   : > { %p530_p13 = scmp.ne.s32.totalorder %s759_s4, %s529_s6  ;;  %p531_p0 = pneg %p761_p11 }
  0x33   : > { %s534_s9 = scalar_lea.hbm %s862_s0, 256  ;;  %p535_p7 = scmp.lt.u32.totalorder %s759_s4, %s862_s0 }
  0x34   : > { %p532_p3 = pnand %p531_p0, %p530_p13  ;;  %p536_p9 = scmp.lt.u32.totalorder %s534_s9, %s529_s6 }
  0x35   : > { %p538_p1 = scmp.lt.u32.totalorder %s529_s6, %s759_s4 }
  0x36   : > { %p533_p5 = pneg %p532_p3  ;;  %p537_p2 = por %p536_p9, %p535_p7 }
  0x38   : > { %p539_p4 = por %p538_p1, %p537_p2 }
  0x3a   : > { %p540_p6 = pnand %p539_p4, %p533_p5 }
  0x3c   : > { %543 = shalt.err (!%p540_p6)
}
  0x3d   : > { %s544_s27 = scalar_lea.vmem %s765_s25, 128  ;;  %s634_s28 = smov [#allocation2]  }
  0x3e   : > { %p545_p8 = scmp.ne.s32.totalorder %s765_s25, %s544_s27  ;;  %s549_s29 = sshll.u32 %s634_s28, 4  ;;  %s550_s29 = int_to_ptr.vmem [resolvable:$false] %s549_s29 }
  0x3f   : > { %s551_s23 = scalar_lea.vmem %s550_s29, 256  ;;  %p552_p3 = scmp.lt.s32.totalorder %s765_s25, %s550_s29 }
  0x40   : > { %p547_p10 = pnand %p545_p8, %p531_p0  ;;  %p553_p7 = scmp.lt.s32.totalorder %s551_s23, %s544_s27 }
  0x42   : > { %p548_p13 = pneg %p547_p10  ;;  %p554_p9 = por %p553_p7, %p552_p3 }
  0x44   : > { %p555_p2 = pnand %p554_p9, %p548_p13 }
  0x46   : > { %558 = shalt.err (!%p555_p2)
}
  0x47   : > { %452 = dma.hbm_to_vmem [thread:$0]  (!%p761_p11), %s759_s4, 128, %s765_s25, %s149_s5  }
  0x48   : > { %p876_p5 = scmp.ne.s32.totalorder %s871_s20, 0 }
  0x49   : > { %s795_s30 = sand.u32 (!%p876_p5), 1, %s621_s13   ;;  %p877_p0 = scmp.ne.s32.totalorder (!%p876_p5), %s869_s18, 0 }
  0x4a   : > { %168 = sbr.rel (%p876_p5) target bundleno = 486 (0x1e6), region = 32  ;;  %s397_s22 = sshll.u32 (!%p876_p5), %s795_s30, 3 }
  0x4b   : > { %s171_s6 = scalar_lea.sflag (!%p876_p5), [#allocation3], %s795_s30  ;;  %s174_s7 = scalar_lea.vmem (!%p876_p5), [#allocation2], %s397_s22 }
  0x51   : > { %604 = dma.done.wait (%p877_p0), %s171_s6, 128  }
  0x52   : > { %606 = vsyncadd (%p877_p0), %s171_s6, 4294967168  ;;  %p878_p11 = scmp.eq.s32.totalorder %s680_s16, 0 }
  0x54   : > { %608 = dma.done.wait (%p878_p11), [#allocation6], 768   ;;  %p879_p1 = pmov %p878_p11 }
  0x55   : > { %v635_v0 = vmov 0.0|0.0   ;;  %vm636_vm0 = vmmov 0   ;;  %v637_v1 = vmov 0.0   ;;  %v202_v2 = vld [vmem:[#allocation5] sm:$0xff]  ;;  %v203_v3 = vld [vmem:[#allocation5 + $0x8] sm:$0xff]  ;;  %v204_v4 = vld [vmem:[#allocation5 + $0x10] sm:$0xff] }
  0x56   : > { %610 = vsyncadd (%p879_p1), [#allocation6], 4294966528  ;;  %428 = vmatprep.subr.bf16.mxu0 %v635_v0  ;;  %425 = vmatprep.mubr.msk.f32.mxu0 %vm636_vm0, %v637_v1  ;;  %v429_v5 = vpack.c.bf16 %v203_v3, %v202_v2  ;;  %v205_v6 = vld [vmem:[#allocation5 + $0x18] sm:$0xff]  ;;  %v206_v8 = vld [vmem:[#allocation5 + $0x20] sm:$0xff]  ;;  %vm215_vm1 = vcmask 392192   ;;  %s403_s4 = sshll.u32 %s680_s16, 7 }
  0x57   : > { %v432_v7 = vpack.c.bf16 %v205_v6, %v204_v4  ;;  %v207_v9 = vld [vmem:[#allocation5 + $0x28] sm:$0xff]  ;;  %v201_v11 = vld [vmem:[%s174_s7] sm:$0xff]  ;;  %s200_s25 = scalar_lea.vmem [#allocation7], %s397_s22  ;;  %s818_s9 = scalar_lea.hbm %s865_s3, %s403_s4 }
  0x58   : > { %430 = vmatpush3.bf16.msra.mxu0 %v429_v5  ;;  %v435_v10 = vpack.c.bf16 %v207_v9, %v206_v8  ;;  %v400_v12 = vld [vmem:[%s864_s2] ss:$0 sm:$0xff]  ;;  %s310_s26 = sshll.u32 %s200_s25, 4  ;;  %s297_s10 = scalar_lea.sflag [#allocation4], %s795_s30  ;;  %s820_s26 = int_to_ptr.vmem [resolvable:$true] %s310_s26 }
  0x59   : > { %431 = vmatprep.subr.bf16.mxu0 %v635_v0  ;;  %s559_s11 = scalar_lea.vmem %s820_s26, 128  ;;  %s638_s16 = smov [#allocation7]  }
  0x5a   : > { %p560_p4 = scmp.ne.s32.totalorder %s820_s26, %s559_s11  ;;  %s563_s27 = sshll.u32 %s638_s16, 4  ;;  %s564_s27 = int_to_ptr.vmem [resolvable:$false] %s563_s27 }
  0x5b   : > { %s565_s28 = scalar_lea.vmem %s564_s27, 256  ;;  %p566_p10 = scmp.lt.s32.totalorder %s820_s26, %s564_s27 }
  0x5c   : > { %433 = vmatpush3.bf16.msra.mxu0 %v432_v7  ;;  %p561_p6 = pnand %p560_p4, %p750_p12  ;;  %p567_p13 = scmp.lt.s32.totalorder %s565_s28, %s559_s11 }
  0x5d   : > { %434 = vmatprep.subr.bf16.mxu0 %v635_v0 }
  0x5e   : > { %p562_p8 = pneg %p561_p6  ;;  %p568_p3 = por %p567_p13, %p566_p10 }
  0x60   : > { %436 = vmatpush3.bf16.msra.mxu0 %v435_v10  ;;  %p569_p7 = pnand %p568_p3, %p562_p8 }
  0x63   : > { %426 = vmatmul.mubr.msk.f32.vlgmr.msra.gmra.mrb[0].mxu0 %vm215_vm1, %v201_v11 }
 0x136   : > { %v285_v13 = vpop.f32.mrb[0].mxu0 }
 0x137   : > { %v286_v14 = vadd.f32 %v400_v12, %v285_v13  ;;  %v427_v15 = vpop.f32.mrb[1].mxu0 }
 0x139   : > { %v289_v16 = vmul.f32 %v286_v14, %v286_v14 }
 0x13b   : > { %290 = vadd.xlane.f32.xlu0 %v289_v16 }
 0x1c8   : > { %v291_v17 = vpop.xlane.xlu0 %290 }
 0x1c9   : > { %v292_v18 = vmax.f32 %v291_v17, 1.1754944e-38 }
 0x1cb   : > { %499 = vrsqrt.f32 %v292_v18 }
 0x1d5   : > { %v500_v19 = vpop.eup %499 }
 0x1d6   : > { %v294_v20 = vmul.f32 %v500_v19, %v286_v14 }
 0x1d8   : > { %295 = vst [vmem:[%s200_s25] sm:$0xff] %v294_v20 }
 0x1d9   : > { %572 = shalt.err (!%p569_p7)
}
 0x1da   : > { %s573_s29 = scalar_lea.hbm %s818_s9, 128  ;;  %s577_s22 = scalar_lea.hbm %s865_s3, 256 }
 0x1db   : > { %p574_p9 = scmp.ne.s32.totalorder %s818_s9, %s573_s29  ;;  %p578_p0 = scmp.lt.u32.totalorder %s818_s9, %s865_s3 }
 0x1dc   : > { %p579_p11 = scmp.lt.u32.totalorder %s577_s22, %s573_s29  ;;  %p581_p4 = scmp.lt.u32.totalorder %s573_s29, %s818_s9 }
 0x1dd   : > { %p575_p2 = pnand %p574_p9, %p750_p12 }
 0x1de   : > { %p580_p1 = por %p579_p11, %p578_p0 }
 0x1df   : > { %p576_p5 = pneg %p575_p2 }
 0x1e0   : > { %p582_p6 = por %p581_p4, %p580_p1 }
 0x1e2   : > { %p583_p8 = pnand %p582_p6, %p576_p5 }
 0x1e4   : > { %586 = shalt.err (!%p583_p8)
}
 0x1e5   : > { %443 = dma.vmem_to_hbm [thread:$0]  (%p750_p12), %s820_s26, 128, %s818_s9, %s297_s10  }
 0x1e6 PF: > { %s322_s18 = sand.u32 1, %s617_s12   ;;  %p880_p10 = scmp.ne.s32.totalorder %s870_s19, 0 }
 0x1e7   : > { %p881_p13 = scmp.ge.s32.totalorder %s629_s15, 2  ;;  %s323_s20 = scalar_lea.sflag [#allocation4], %s322_s18 }
 0x1e9   : > { %p454_p3 = pnand %p881_p13, %p880_p10 }
 0x1eb   : > { %612 = dma.done.wait (!%p454_p3), %s323_s20, 128  }
 0x1ec   : > { %614 = vsyncadd (!%p454_p3), %s323_s20, 4294967168  ;;  %p17_p7 = scmp.ge.s32.totalorder %s715_s24, 4   ;;  %s882_s12 = smov %s621_s13 }
 0x1ed   : > { %s883_s13 = smov %s625_s14  ;;  %s884_s14 = smov %s746_s17 }
 0x1ee   : > { %s885_s15 = smov %s715_s24  ;;  %19 = sbr.rel (!%p17_p7) target bundleno = 6 (0x6), region = 81 }
 0x1f5   :  { %328 = vsyncpa [#allocation3], 1 }
 0x1f6   :  { %330 = vsyncpa [#allocation3 + $0x1], 1 }
 0x1f7   :  { %331 = vsyncpa [#allocation6], 1 }
 0x1f8   :  { %332 = vsyncpa [#allocation4], 1 }
 0x1f9   :  { %334 = vsyncpa [#allocation4 + $0x1], 1 }

// kernel: tpu_custom_call.1
= control target key start
LH: loop header
LB: loop body
LE: loop exit
PB: predicated region body
PF: predicated region fallthrough
CT: control target
= control target key end

     0   :  { %8 = vsyncpa [#allocation3], 0  ;;  %s862_s0 = inlined_call_operand.hbm [shape: f32[16,48], index: 0, kind: input, shape index: {}]   ;;  %s863_s1 = inlined_call_operand.hbm [shape: f32[48,128], index: 1, kind: input, shape index: {}]   ;;  %s864_s2 = inlined_call_operand.vmem [shape: f32[1,128], index: 2, kind: input, shape index: {}]   ;;  %s865_s3 = inlined_call_operand.hbm [shape: f32[16,128], index: 3, kind: output, shape index: {}]  }
   0x1   :  { %10 = vsyncpa [#allocation3 + $0x1], 0 }
   0x2   :  { %11 = vsyncpa [#allocation6], 0 }
   0x3   :  { %12 = vsyncpa [#allocation4], 0 }
   0x4   :  { %14 = vsyncpa [#allocation4 + $0x1], 0  ;;  %s659_s12 = smov 0   ;;  %s661_s13 = smov 0  }
   0x5   :  { %s663_s14 = smov 0   ;;  %s665_s15 = smov 0  }
   0x6 LB: > { %s680_s16 = sadd.s32 4294967295, %s629_s15   ;;  %s390_s17 = sadd.s32 4294967294, %s629_s15   ;;  %s629_s15 = sphi %s665_s15, %s885_s15   ;;  %s625_s14 = sphi %s663_s14, %s884_s14   ;;  %s621_s13 = sphi %s661_s13, %s883_s13   ;;  %s617_s12 = sphi %s659_s12, %s882_s12  }
   0x7   : > { %p40_p0 = scmp.ne.s32.totalorder %s621_s13, %s617_s12  ;;  %p866_p1 = scmp.eq.s32.totalorder %s680_s16, 0 }
   0x8   : > { %p112_p3 = scmp.eq.s32.totalorder %s390_s17, 1  ;;  %p391_p5 = scmp.ge.s32.totalorder %s629_s15, 1 }
   0x9   : > { %p689_p4 = por %p866_p1, %p40_p0  ;;  %p119_p7 = scmp.lt.s32.totalorder %s629_s15, 3 }
   0xa   : > { %p694_p6 = por %p112_p3, %p40_p0  ;;  %s631_s21 = smov [#allocation5]  }
   0xb   : > { %s869_s18 = scalar_select %p689_p4, 1, 0 }
   0xc   : > { %s870_s19 = scalar_select %p694_p6, 1, 0 }
   0xd   : > { %p699_p8 = pnand %p391_p5, %p119_p7  ;;  %s131_s22 = sshll.u32 %s631_s21, 4  ;;  %s703_s22 = int_to_ptr.vmem [resolvable:$true] %s131_s22 }
   0xe   : > { %s715_s24 = sadd.s32 1, %s629_s15   ;;  %s27_s25 = sadd.s32 1, %s625_s14 }
   0xf   : > { %s871_s20 = scalar_select %p699_p8, 1, 0 }
  0x10   : > { %p445_p9 = pneg %p699_p8  ;;  %s24_s26 = ssub.s32 %s629_s15, %s715_s24 }
  0x11   : > { %s501_s29 = scalar_lea.hbm %s863_s1, 768 }
  0x12   : > { %p710_p11 = pnand %p445_p9, %p866_p1  ;;  %p502_p12 = scmp.ne.s32.totalorder %s863_s1, %s501_s29 }
  0x13   : > { %p508_p5 = scmp.lt.u32.totalorder %s501_s29, %s863_s1 }
  0x14   : > { %p503_p13 = pneg %p710_p11 }
  0x16   : > { %p504_p0 = pnand %p503_p13, %p502_p12 }
  0x18   : > { %p505_p3 = pneg %p504_p0 }
  0x1a   : > { %p510_p7 = pnand %p508_p5, %p505_p3 }
  0x1c   : > { %513 = shalt.err (!%p510_p7)
}
  0x1d   : > { %s514_s7 = scalar_lea.vmem %s703_s22, 768  ;;  %p522_p2 = scmp.lt.s32.totalorder %s703_s22, %s703_s22 }
  0x1e   : > { %p515_p9 = scmp.ne.s32.totalorder %s703_s22, %s514_s7  ;;  %p523_p6 = scmp.lt.s32.totalorder %s514_s7, %s514_s7 }
  0x20   : > { %p517_p10 = pnand %p515_p9, %p503_p13  ;;  %p524_p4 = por %p523_p6, %p522_p2 }
  0x22   : > { %p518_p1 = pneg %p517_p10 }
  0x24   : > { %p525_p8 = pnand %p524_p4, %p518_p1 }
  0x26   : > { %528 = shalt.err (!%p525_p8)
}
  0x27   : > { %s632_s8 = smov 128   ;;  %s633_s9 = smov 8  }
  0x28   : > { %448 = dma.hbm_to_vmem [thread:$0]  (!%p710_p11), %s863_s1, 768, %s703_s22, [#allocation6], %s632_s8, %s632_s8, %s633_s9  }
  0x29   : > { %p25_p2 = scmp.eq.s32.totalorder %s24_s26, 0  ;;  %p34_p1 = scmp.ne.s32.totalorder %s625_s14, %s621_s13 }
  0x2a   : > { %p35_p4 = scmp.eq.s32.totalorder %s629_s15, 0  ;;  %p458_p6 = scmp.lt.s32.totalorder %s629_s15, 2 }
  0x2b   : > { %s746_s17 = scalar_select %p25_p2, %s625_s14, %s27_s25  }
  0x2c   : > { %p36_p8 = por %p35_p4, %p34_p1  ;;  %p873_p10 = scmp.eq.s32.totalorder %s680_s16, 1 }
  0x2d   : > { %s148_s27 = sand.u32 1, %s625_s14   ;;  %s395_s28 = sshll.u32 %s629_s15, 7 }
  0x2e   : > { %p750_p12 = por %p873_p10, %p34_p1  ;;  %s394_s29 = sshll.u32 %s148_s27, 3 }
  0x2f   : > { %s759_s4 = scalar_lea.hbm %s862_s0, %s395_s28  ;;  %s152_s22 = scalar_lea.vmem [#allocation2], %s394_s29 }
  0x30   : > { %s159_s25 = sshll.u32 %s152_s22, 4  ;;  %p761_p11 = pnand %p458_p6, %p36_p8  ;;  %s765_s25 = int_to_ptr.vmem [resolvable:$true] %s159_s25 }
  0x31   : > { %s149_s5 = scalar_lea.sflag [#allocation3], %s148_s27  ;;  %s529_s6 = scalar_lea.hbm %s759_s4, 128 }
  0x32   : > { %p530_p13 = scmp.ne.s32.totalorder %s759_s4, %s529_s6  ;;  %p531_p0 = pneg %p761_p11 }
  0x33   : > { %s534_s9 = scalar_lea.hbm %s862_s0, 256  ;;  %p535_p7 = scmp.lt.u32.totalorder %s759_s4, %s862_s0 }
  0x34   : > { %p532_p3 = pnand %p531_p0, %p530_p13  ;;  %p536_p9 = scmp.lt.u32.totalorder %s534_s9, %s529_s6 }
  0x35   : > { %p538_p1 = scmp.lt.u32.totalorder %s529_s6, %s759_s4 }
  0x36   : > { %p533_p5 = pneg %p532_p3  ;;  %p537_p2 = por %p536_p9, %p535_p7 }
  0x38   : > { %p539_p4 = por %p538_p1, %p537_p2 }
  0x3a   : > { %p540_p6 = pnand %p539_p4, %p533_p5 }
  0x3c   : > { %543 = shalt.err (!%p540_p6)
}
  0x3d   : > { %s544_s27 = scalar_lea.vmem %s765_s25, 128  ;;  %s634_s28 = smov [#allocation2]  }
  0x3e   : > { %p545_p8 = scmp.ne.s32.totalorder %s765_s25, %s544_s27  ;;  %s549_s29 = sshll.u32 %s634_s28, 4  ;;  %s550_s29 = int_to_ptr.vmem [resolvable:$false] %s549_s29 }
  0x3f   : > { %s551_s23 = scalar_lea.vmem %s550_s29, 256  ;;  %p552_p3 = scmp.lt.s32.totalorder %s765_s25, %s550_s29 }
  0x40   : > { %p547_p10 = pnand %p545_p8, %p531_p0  ;;  %p553_p7 = scmp.lt.s32.totalorder %s551_s23, %s544_s27 }
  0x42   : > { %p548_p13 = pneg %p547_p10  ;;  %p554_p9 = por %p553_p7, %p552_p3 }
  0x44   : > { %p555_p2 = pnand %p554_p9, %p548_p13 }
  0x46   : > { %558 = shalt.err (!%p555_p2)
}
  0x47   : > { %452 = dma.hbm_to_vmem [thread:$0]  (!%p761_p11), %s759_s4, 128, %s765_s25, %s149_s5  }
  0x48   : > { %p876_p5 = scmp.ne.s32.totalorder %s871_s20, 0 }
  0x49   : > { %s795_s30 = sand.u32 (!%p876_p5), 1, %s621_s13   ;;  %p877_p0 = scmp.ne.s32.totalorder (!%p876_p5), %s869_s18, 0 }
  0x4a   : > { %168 = sbr.rel (%p876_p5) target bundleno = 486 (0x1e6), region = 32  ;;  %s397_s22 = sshll.u32 (!%p876_p5), %s795_s30, 3 }
  0x4b   : > { %s171_s6 = scalar_lea.sflag (!%p876_p5), [#allocation3], %s795_s30  ;;  %s174_s7 = scalar_lea.vmem (!%p876_p5), [#allocation2], %s397_s22 }
  0x51   : > { %604 = dma.done.wait (%p877_p0), %s171_s6, 128  }
  0x52   : > { %606 = vsyncadd (%p877_p0), %s171_s6, 4294967168  ;;  %p878_p11 = scmp.eq.s32.totalorder %s680_s16, 0 }
  0x54   : > { %608 = dma.done.wait (%p878_p11), [#allocation6], 768   ;;  %p879_p1 = pmov %p878_p11 }
  0x55   : > { %v635_v0 = vmov 0.0|0.0   ;;  %vm636_vm0 = vmmov 0   ;;  %v637_v1 = vmov 0.0   ;;  %v202_v2 = vld [vmem:[#allocation5] sm:$0xff]  ;;  %v203_v3 = vld [vmem:[#allocation5 + $0x8] sm:$0xff]  ;;  %v204_v4 = vld [vmem:[#allocation5 + $0x10] sm:$0xff] }
  0x56   : > { %610 = vsyncadd (%p879_p1), [#allocation6], 4294966528  ;;  %428 = vmatprep.subr.bf16.mxu0 %v635_v0  ;;  %425 = vmatprep.mubr.msk.f32.mxu0 %vm636_vm0, %v637_v1  ;;  %v429_v5 = vpack.c.bf16 %v203_v3, %v202_v2  ;;  %v205_v6 = vld [vmem:[#allocation5 + $0x18] sm:$0xff]  ;;  %v206_v8 = vld [vmem:[#allocation5 + $0x20] sm:$0xff]  ;;  %vm215_vm1 = vcmask 392192   ;;  %s403_s4 = sshll.u32 %s680_s16, 7 }
  0x57   : > { %v432_v7 = vpack.c.bf16 %v205_v6, %v204_v4  ;;  %v207_v9 = vld [vmem:[#allocation5 + $0x28] sm:$0xff]  ;;  %v201_v11 = vld [vmem:[%s174_s7] sm:$0xff]  ;;  %s200_s25 = scalar_lea.vmem [#allocation7], %s397_s22  ;;  %s818_s9 = scalar_lea.hbm %s865_s3, %s403_s4 }
  0x58   : > { %430 = vmatpush3.bf16.msra.mxu0 %v429_v5  ;;  %v435_v10 = vpack.c.bf16 %v207_v9, %v206_v8  ;;  %v400_v12 = vld [vmem:[%s864_s2] ss:$0 sm:$0xff]  ;;  %s310_s26 = sshll.u32 %s200_s25, 4  ;;  %s297_s10 = scalar_lea.sflag [#allocation4], %s795_s30  ;;  %s820_s26 = int_to_ptr.vmem [resolvable:$true] %s310_s26 }
  0x59   : > { %431 = vmatprep.subr.bf16.mxu0 %v635_v0  ;;  %s559_s11 = scalar_lea.vmem %s820_s26, 128  ;;  %s638_s16 = smov [#allocation7]  }
  0x5a   : > { %p560_p4 = scmp.ne.s32.totalorder %s820_s26, %s559_s11  ;;  %s563_s27 = sshll.u32 %s638_s16, 4  ;;  %s564_s27 = int_to_ptr.vmem [resolvable:$false] %s563_s27 }
  0x5b   : > { %s565_s28 = scalar_lea.vmem %s564_s27, 256  ;;  %p566_p10 = scmp.lt.s32.totalorder %s820_s26, %s564_s27 }
  0x5c   : > { %433 = vmatpush3.bf16.msra.mxu0 %v432_v7  ;;  %p561_p6 = pnand %p560_p4, %p750_p12  ;;  %p567_p13 = scmp.lt.s32.totalorder %s565_s28, %s559_s11 }
  0x5d   : > { %434 = vmatprep.subr.bf16.mxu0 %v635_v0 }
  0x5e   : > { %p562_p8 = pneg %p561_p6  ;;  %p568_p3 = por %p567_p13, %p566_p10 }
  0x60   : > { %436 = vmatpush3.bf16.msra.mxu0 %v435_v10  ;;  %p569_p7 = pnand %p568_p3, %p562_p8 }
  0x63   : > { %426 = vmatmul.mubr.msk.f32.vlgmr.msra.gmra.mrb[0].mxu0 %vm215_vm1, %v201_v11 }
 0x136   : > { %v285_v13 = vpop.f32.mrb[0].mxu0 }
 0x137   : > { %v286_v14 = vadd.f32 %v400_v12, %v285_v13  ;;  %v427_v15 = vpop.f32.mrb[1].mxu0 }
 0x139   : > { %v289_v16 = vmul.f32 %v286_v14, %v286_v14 }
 0x13b   : > { %290 = vadd.xlane.f32.xlu0 %v289_v16 }
 0x1c8   : > { %v291_v17 = vpop.xlane.xlu0 %290 }
 0x1c9   : > { %v292_v18 = vmax.f32 %v291_v17, 1.1754944e-38 }
 0x1cb   : > { %499 = vrsqrt.f32 %v292_v18 }
 0x1d5   : > { %v500_v19 = vpop.eup %499 }
 0x1d6   : > { %v294_v20 = vmul.f32 %v500_v19, %v286_v14 }
 0x1d8   : > { %295 = vst [vmem:[%s200_s25] sm:$0xff] %v294_v20 }
 0x1d9   : > { %572 = shalt.err (!%p569_p7)
}
 0x1da   : > { %s573_s29 = scalar_lea.hbm %s818_s9, 128  ;;  %s577_s22 = scalar_lea.hbm %s865_s3, 256 }
 0x1db   : > { %p574_p9 = scmp.ne.s32.totalorder %s818_s9, %s573_s29  ;;  %p578_p0 = scmp.lt.u32.totalorder %s818_s9, %s865_s3 }
 0x1dc   : > { %p579_p11 = scmp.lt.u32.totalorder %s577_s22, %s573_s29  ;;  %p581_p4 = scmp.lt.u32.totalorder %s573_s29, %s818_s9 }
 0x1dd   : > { %p575_p2 = pnand %p574_p9, %p750_p12 }
 0x1de   : > { %p580_p1 = por %p579_p11, %p578_p0 }
 0x1df   : > { %p576_p5 = pneg %p575_p2 }
 0x1e0   : > { %p582_p6 = por %p581_p4, %p580_p1 }
 0x1e2   : > { %p583_p8 = pnand %p582_p6, %p576_p5 }
 0x1e4   : > { %586 = shalt.err (!%p583_p8)
}
 0x1e5   : > { %443 = dma.vmem_to_hbm [thread:$0]  (%p750_p12), %s820_s26, 128, %s818_s9, %s297_s10  }
 0x1e6 PF: > { %s322_s18 = sand.u32 1, %s617_s12   ;;  %p880_p10 = scmp.ne.s32.totalorder %s870_s19, 0 }
 0x1e7   : > { %p881_p13 = scmp.ge.s32.totalorder %s629_s15, 2  ;;  %s323_s20 = scalar_lea.sflag [#allocation4], %s322_s18 }
 0x1e9   : > { %p454_p3 = pnand %p881_p13, %p880_p10 }
 0x1eb   : > { %612 = dma.done.wait (!%p454_p3), %s323_s20, 128  }
 0x1ec   : > { %614 = vsyncadd (!%p454_p3), %s323_s20, 4294967168  ;;  %p17_p7 = scmp.ge.s32.totalorder %s715_s24, 4   ;;  %s882_s12 = smov %s621_s13 }
 0x1ed   : > { %s883_s13 = smov %s625_s14  ;;  %s884_s14 = smov %s746_s17 }
 0x1ee   : > { %s885_s15 = smov %s715_s24  ;;  %19 = sbr.rel (!%p17_p7) target bundleno = 6 (0x6), region = 81 }
 0x1f5   :  { %328 = vsyncpa [#allocation3], 1 }
 0x1f6   :  { %330 = vsyncpa [#allocation3 + $0x1], 1 }
 0x1f7   :  { %331 = vsyncpa [#allocation6], 1 }
 0x1f8   :  { %332 = vsyncpa [#allocation4], 1 }
 0x1f9   :  { %334 = vsyncpa [#allocation4 + $0x1], 1 }

</bundles_post_ra>
